<compile_context>
chip_gen: v6e
topology: v6e:2x2x1
jax: 0.10.0
libtpu: 0.0.40
codegen_flags: <defaults>
</compile_context>

<pallas_src>
import functools

import jax
import jax.numpy as jnp
from jax.experimental import pallas as pl
from jax.experimental.pallas import tpu as pltpu


def _round_up(a, b):
    return -(-a // b) * b


def otu_weights_kernel(k_scale, eta_ref, kappa_ref, dist_ref, dist_sq_ref, w_ref):
    eta = eta_ref[...]                                             # (RC, E) f32
    d = dist_ref[...]                                              # (J, E)  f32
    # Cross term on the MXU: (RC, E) x (J, E) contracted over E -> (RC, J).
    gram = jax.lax.dot_general(
        eta, d, (((1,), (1,)), ((), ())), preferred_element_type=jnp.float32)
    eta_sq = jnp.sum(eta * eta, axis=-1, keepdims=True)            # (RC, 1)
    d2 = eta_sq + dist_sq_ref[...] - 2.0 * gram                    # (RC, J)
    # Clamp: cancellation in the squared-norm expansion can go slightly negative.
    emb_dist = jnp.sqrt(jnp.maximum(d2, 0.0))
    kappa = jnp.exp(kappa_ref[...])                                # (RC, 1)
    w = jax.nn.sigmoid((kappa - emb_dist) * k_scale)               # (RC, J)
    # TODO(synk): torch raises ValueError on NaN in w at runtime; no in-kernel
    # exception mechanism exists, so that check (and the self.wts caching) is omitted.
    w_ref[...] = w.astype(w_ref.dtype)


def weighted_agg_kernel(w_ref, x_ref, o_ref):
    w = w_ref[...]                                                 # (RC, J)
    x = x_ref[...].astype(w.dtype)                                 # (J, TILE_N), no-op cast
    # einsum 'kij,sjt->skit' == W @ X on this layout; f32 accumulation on the MXU.
    o_ref[...] = jnp.dot(w, x, preferred_element_type=jnp.float32).astype(o_ref.dtype)


def _choose_tile_n(ST, J, RC, x_itemsize, w_itemsize, budget_bytes):
    """Largest 128-multiple tile along S*T whose double-buffered footprint fits budget."""
    fixed = 2 * RC * J * w_itemsize              # W (conservatively assume 2 buffers)
    per_col = 2 * (J * x_itemsize + RC * 4)      # double-buffered X tile + f32 out tile
    avail = budget_bytes - fixed - (2 << 20)     # headroom for compiler scratch
    tile = (max(avail, per_col * 128) // per_col // 128) * 128
    tile = max(128, min(tile, _round_up(ST, 128), 4096))
    return int(tile)


def spatial_agg_dynamic(x, eta, kappa, dist, k=1.0, *,
                        tile_n=None, use_bf16_matmul=True):
    """x: (S, J, T); eta: (R, C, E); kappa: (R, C); dist: (J, E).

    Returns (S, R, C, T) float32, matching SpatialAggDynamic.forward.
    """
    S, J, T = x.shape
    R, C, E = eta.shape
    RC = R * C
    ST = S * T

    eta2 = eta.reshape(RC, E).astype(jnp.float32)
    kappa2 = kappa.reshape(RC, 1).astype(jnp.float32)
    dist2 = dist.astype(jnp.float32)
    dist_sq = jnp.sum(dist2 * dist2, axis=-1)[None, :]             # (1, J)

    w_dtype = jnp.bfloat16 if use_bf16_matmul else jnp.float32
    w_itemsize = jnp.dtype(w_dtype).itemsize

    # ---- kernel 1: OTU weights (runs once, tiny) -----------------------------
    w = pl.pallas_call(
        functools.partial(otu_weights_kernel, float(k)),
        out_shape=jax.ShapeDtypeStruct((RC, J), w_dtype),
        in_specs=[pl.BlockSpec(memory_space=pltpu.MemorySpace.VMEM)] * 4,
        out_specs=pl.BlockSpec(memory_space=pltpu.MemorySpace.VMEM),
    )(eta2, kappa2, dist2, dist_sq)

    # ---- kernel 2: out = W @ X, tiled over the lane-dense S*T axis -----------
    # (S, J, T) -> (J, S*T): x_r[j, s*T + t] = x[s, j, t].  Cast to the matmul
    # dtype *before* the transpose so the bf16 path streams half the bytes.
    # TODO(synk): for T >= 128 one could instead grid over S in native (S, J, T)
    # layout and skip this transpose; with small T the (J, S*T) slab keeps the
    # output stores lane-dense, which is the bigger measured win.
    x_r = jnp.transpose(x.astype(w_dtype), (1, 0, 2)).reshape(J, ST)
    x_itemsize = jnp.dtype(w_dtype).itemsize

    # Safe scoped-VMEM budget across v5e/v6e (128 MiB phys) and v7x (64 MiB phys).
    vmem_budget = 48 * 1024 * 1024
    if tile_n is None:
        tile_n = _choose_tile_n(ST, J, RC, x_itemsize, w_itemsize, vmem_budget)
    else:
        tile_n = max(128, _round_up(min(tile_n, ST), 128))

    n_pad = _round_up(ST, tile_n)
    if n_pad != ST:
        x_r = jnp.pad(x_r, ((0, 0), (0, n_pad - ST)))
    num_tiles = n_pad // tile_n

    # Double-buffered X and out tiles + W + headroom.
    vmem_bytes = (2 * tile_n * (J * x_itemsize + RC * 4)
                  + 2 * RC * J * w_itemsize + (4 << 20))

    out2 = pl.pallas_call(
        weighted_agg_kernel,
        out_shape=jax.ShapeDtypeStruct((RC, n_pad), jnp.float32),
        grid_spec=pltpu.PrefetchScalarGridSpec(
            num_scalar_prefetch=0,
            grid=(num_tiles,),
            in_specs=[
                pl.BlockSpec((RC, J), lambda i: (0, 0)),           # W: fetched once
                pl.BlockSpec((J, tile_n), lambda i: (0, i)),       # X: streamed
            ],
            out_specs=pl.BlockSpec((RC, tile_n), lambda i: (0, i)),
        ),
        compiler_params=pltpu.CompilerParams(
            dimension_semantics=("parallel",),                     # v7x: 2 TCs share the grid
            vmem_limit_bytes=int(min(vmem_bytes, 60 * 1024 * 1024)),
        ),
        cost_estimate=pl.CostEstimate(
            flops=2 * RC * J * n_pad,
            transcendentals=0,
            bytes_accessed=J * n_pad * x_itemsize + RC * J * w_itemsize + RC * n_pad * 4,
        ),
    )(w, x_r)

    # (RC, n_pad) -> (S, R, C, T)
    out2 = out2[:, :ST]
    return out2.reshape(RC, S, T).transpose(1, 0, 2).reshape(S, R, C, T)


def _reference(x, eta, kappa, dist, k=1.0):
    R, C, E = eta.shape
    emb_dist = jnp.linalg.norm(
        eta.reshape(R, C, 1, E) - dist[None, None, :, :], axis=-1)   # (R, C, J)
    kap = jnp.exp(kappa)[..., None]                                  # (R, C, 1)
    w = jax.nn.sigmoid((kap - emb_dist) * k)                         # (R, C, J)
    return jnp.einsum('rcj,sjt->srct', w, x)


if __name__ == "__main__":
    # Module hyper-parameters (small, consistent with the torch __init__).
    num_rules = 2
    num_otu_centers = 4
    emb_dim = 32
    num_otus = 16
    batch = 2
    time_steps = 8

    key = jax.random.PRNGKey(0)
    k_eta, k_kappa, k_dist, k_x = jax.random.split(key, 4)

    eta = jax.random.normal(k_eta, (num_rules, num_otu_centers, emb_dim), jnp.float32)
    kappa = 0.1 * jax.random.normal(k_kappa, (num_rules, num_otu_centers), jnp.float32)
    dist = jax.random.normal(k_dist, (num_otus, emb_dim), jnp.float32)      # 'dist' buffer
    x = jax.random.normal(k_x, (batch, num_otus, time_steps), jnp.float32)  # (S, J, T)

    ref = _reference(x, eta, kappa, dist, k=1.0)

    # f32 MXU path: tight check against the pure-JAX reference.
    out_f32 = jax.block_until_ready(
        spatial_agg_dynamic(x, eta, kappa, dist, k=1.0, use_bf16_matmul=False))
    assert out_f32.shape == (batch, num_rules, num_otu_centers, time_steps)
    assert jnp.allclose(out_f32, ref, atol=1e-4, rtol=1e-4)

    # bf16 MXU path (default / fast): bf16 W and X, f32 accumulation.
    out_bf16 = jax.block_until_ready(
        spatial_agg_dynamic(x, eta, kappa, dist, k=1.0, use_bf16_matmul=True))
    assert out_bf16.shape == (batch, num_rules, num_otu_centers, time_steps)
    assert jnp.allclose(out_bf16, ref, atol=5e-3, rtol=5e-2)

    print("KERNEL_OK")
</pallas_src>

<mosaic_0001>
module attributes {stable_mosaic.version = 11 : i64} {
  func.func @otu_weights_kernel(%arg0: memref<8x32xf32, #tpu.memory_space<vmem>>, %arg1: memref<8x1xf32, #tpu.memory_space<vmem>>, %arg2: memref<16x32xf32, #tpu.memory_space<vmem>>, %arg3: memref<1x16xf32, #tpu.memory_space<vmem>>, %arg4: memref<8x16xf32, #tpu.memory_space<vmem>>) attributes {dimension_semantics = [], scalar_prefetch = 0 : i64, scratch_operands = 0 : i64, tpu.core_type = #tpu.core_type<tc>} {
    %c0 = arith.constant 0 : index
    %c0_0 = arith.constant 0 : index
    %0 = vector.load %arg0[%c0, %c0_0] : memref<8x32xf32, #tpu.memory_space<vmem>>, vector<8x32xf32>
    %c0_1 = arith.constant 0 : index
    %c0_2 = arith.constant 0 : index
    %1 = vector.load %arg2[%c0_1, %c0_2] : memref<16x32xf32, #tpu.memory_space<vmem>>, vector<16x32xf32>
    %cst = arith.constant dense<0.000000e+00> : vector<8x16xf32>
    %2 = tpu.matmul %0, %1, %cst {dimension_numbers = #tpu.dot_dimension_numbers<[1], [1], [0], [0], [0, 0, 1, 0], [], []>} : vector<8x32xf32>, vector<16x32xf32>, vector<8x16xf32> -> vector<8x16xf32>
    %3 = arith.mulf %0, %0 : vector<8x32xf32>
    %cst_3 = arith.constant dense<0.000000e+00> : vector<8xf32>
    %4 = vector.multi_reduction <add>, %3, %cst_3 [1] : vector<8x32xf32> to vector<8xf32>
    %5 = vector.shape_cast %4 : vector<8xf32> to vector<8x1xf32>
    %c0_4 = arith.constant 0 : index
    %c0_5 = arith.constant 0 : index
    %6 = vector.load %arg3[%c0_4, %c0_5] : memref<1x16xf32, #tpu.memory_space<vmem>>, vector<1x16xf32>
    %7 = vector.broadcast %5 : vector<8x1xf32> to vector<8x16xf32>
    %8 = vector.broadcast %6 : vector<1x16xf32> to vector<8x16xf32>
    %9 = arith.addf %7, %8 : vector<8x16xf32>
    %cst_6 = arith.constant 2.000000e+00 : f32
    %10 = vector.broadcast %cst_6 : f32 to vector<8x16xf32>
    %11 = arith.mulf %10, %2 : vector<8x16xf32>
    %12 = arith.subf %9, %11 : vector<8x16xf32>
    %cst_7 = arith.constant 0.000000e+00 : f32
    %13 = vector.broadcast %cst_7 : f32 to vector<8x16xf32>
    %14 = arith.maximumf %12, %13 : vector<8x16xf32>
    %15 = math.sqrt %14 : vector<8x16xf32>
    %c0_8 = arith.constant 0 : index
    %c0_9 = arith.constant 0 : index
    %16 = vector.load %arg1[%c0_8, %c0_9] : memref<8x1xf32, #tpu.memory_space<vmem>>, vector<8x1xf32>
    %17 = math.exp %16 : vector<8x1xf32>
    %18 = vector.broadcast %17 : vector<8x1xf32> to vector<8x16xf32>
    %19 = arith.subf %18, %15 : vector<8x16xf32>
    %cst_10 = arith.constant 1.000000e+00 : f32
    %20 = vector.broadcast %cst_10 : f32 to vector<8x16xf32>
    %21 = arith.mulf %19, %20 : vector<8x16xf32>
    %22 = arith.negf %21 : vector<8x16xf32>
    %23 = math.exp %22 : vector<8x16xf32>
    %cst_11 = arith.constant 1.000000e+00 : f32
    %24 = vector.broadcast %cst_11 : f32 to vector<8x16xf32>
    %25 = arith.addf %24, %23 : vector<8x16xf32>
    %26 = arith.divf %24, %25 : vector<8x16xf32>
    %c0_12 = arith.constant 0 : index
    %c0_13 = arith.constant 0 : index
    %27 = vector.load %arg4[%c0_12, %c0_13] : memref<8x16xf32, #tpu.memory_space<vmem>>, vector<8x16xf32>
    tpu.vector_store %arg4[%c0_12, %c0_13], %26 {strides = array<i32>} : memref<8x16xf32, #tpu.memory_space<vmem>>, vector<8x16xf32>,
    return
  }
}

</mosaic_0001>

<bundles_post_ra>
// kernel: tpu_custom_call.1
= control target key start
LH: loop header
LB: loop body
LE: loop exit
PB: predicated region body
PF: predicated region fallthrough
CT: control target
= control target key end

     0   :  { %9 = vsyncpa [#allocation3], 0  ;;  %s291_s0 = inlined_call_operand.vmem [shape: f32[8,32], index: 0, kind: input, shape index: {}]   ;;  %s292_s1 = inlined_call_operand.vmem [shape: f32[8,1], index: 1, kind: input, shape index: {}]   ;;  %s293_s2 = inlined_call_operand.hbm [shape: f32[16,32], index: 2, kind: input, shape index: {}]   ;;  %s294_s3 = inlined_call_operand.vmem [shape: f32[1,16], index: 3, kind: input, shape index: {}]   ;;  %s295_s4 = inlined_call_operand.hbm [shape: f32[8,16], index: 4, kind: output, shape index: {}]  }
   0x1   :  { %10 = vsyncpa [#allocation4], 0  ;;  %s244_s15 = smov [#allocation2]  }
   0x2   :  { %s20_s16 = sshll.u32 %s244_s15, 4  ;;  %s21_s16 = int_to_ptr.vmem [resolvable:$true] %s20_s16 }
   0x3   :  { %s208_s17 = scalar_lea.vmem %s21_s16, 256  ;;  %p213_p1 = scmp.lt.s32.totalorder %s21_s16, %s21_s16 }
   0x4   :  { %p209_p0 = scmp.ne.s32.totalorder %s21_s16, %s208_s17  ;;  %p214_p2 = scmp.lt.s32.totalorder %s208_s17, %s208_s17 }
   0x6   :  { %p215_p3 = por %p214_p2, %p213_p1 }
   0x8   :  { %p216_p4 = pnand %p215_p3, %p209_p0 }
   0xa   :  { %219 = shalt.err (!%p216_p4)
}
   0xb   :  { %s245_s18 = smov 128   ;;  %s246_s19 = smov 8  }
   0xc   :  { %26 = dma.hbm_to_vmem [thread:$0]  %s293_s2, 256, %s21_s16, [#allocation3], %s245_s18, %s245_s18, %s246_s19  }
   0xd   :  { %240 = dma.done.wait [#allocation3], 256  }
   0xe   :  { %241 = vsyncadd [#allocation3], 4294967040  ;;  %v247_v0 = vmov 0.0   ;;  %vm248_vm0 = vmmov 0   ;;  %v249_v1 = vmov 0   ;;  %vm35_vm1 = vcmask 261120  }
   0xf   :  { %177 = vmatprep.subr.mxu0 %v247_v0  ;;  %181 = vmatprep.mubr.msk.f32.mxu0 %vm248_vm0, %v247_v0  ;;  %v34_v2 = vld [vmem:[#allocation2 + $0x8] sm:$0xff]  ;;  %v32_v3 = vld [vmem:[%s291_s0] sm:$0xff]  ;;  %s250_s0 = smov [#allocation5]   ;;  %vm152_vm4 = vcmask 130048  }
  0x10   :  { %191 = vset.pattern.permute.xlu0 %v249_v1  ;;  %178 = vmatpush3.xpose.msk.msra.mxu0 %vm35_vm1, %v34_v2  ;;  %v115_v4 = vmul.f32 %v32_v3, %v32_v3  ;;  %v33_v5 = vld [vmem:[#allocation2] sm:$0xff] }
  0x11   :  { %179 = vmatprep.subr.mxu0 %v247_v0  ;;  %v137_v7 = vld [vmem:[%s292_s1] sm:$0xff]  ;;  %s160_s1 = sshll.u32 %s250_s0, 4  ;;  %s161_s1 = int_to_ptr.vmem [resolvable:$true] %s160_s1 }
  0x12   :  { %v116_v6 = vsel %vm35_vm1, %v115_v4, 0.0  ;;  %v138_v8 = vmul.f32 1.442695, %v137_v7  ;;  %v172_v10 = vld [vmem:[%s294_s3] ss:$0 sm:$0xff]  ;;  %s220_s3 = scalar_lea.vmem %s161_s1, 128  ;;  %p225_p6 = scmp.lt.s32.totalorder %s161_s1, %s161_s1 }
  0x13   :  { %117 = vadd.xlane.f32.xlu0 %v116_v6  ;;  %p221_p5 = scmp.ne.s32.totalorder %s161_s1, %s220_s3  ;;  %p226_p7 = scmp.lt.s32.totalorder %s220_s3, %s220_s3 }
  0x14   :  { %180 = vmatpush3.xpose.msk.msra.mxu0 %vm35_vm1, %v33_v5  ;;  %192 = vpow2.f32 %v138_v8 }
  0x15   :  { %p227_p8 = por %p226_p7, %p225_p6 }
  0x17   :  { %182 = vmatmul.mubr.msk.f32.vlgmr.msra.gmra.mxu0 %vm35_vm1, %v32_v3  ;;  %p228_p9 = pnand %p227_p8, %p221_p5 }
  0x21   :  { %v193_v9 = vpop.eup %192 }
  0x29   :  { %142 = vperm.xlu0 %191, %v193_v9  }
  0x9c   :  { %v118_v11 = vpop.xlane.xlu0 %117 }
  0x9d   :  { %v126_v12 = vadd.f32 %v172_v10, %v118_v11 }
  0xa4   :  { %v143_v20 = vpop.permute.xlu0 %142 }
  0xd7   :  { %v111_v13 = vpop.f32.mrf.mxu0 }
  0xd8   :  { %v127_v14 = vmul.f32 2.0, %v111_v13 }
  0xd9   :  { %v183_v15 = vpop.f32.mrf.mxu0 }
  0xda   :  { %v128_v16 = vsub.f32 %v126_v12, %v127_v14 }
  0xdc   :  { %v129_v17 = vmax.f32 %v128_v16, 0.0 }
  0xde   :  { %194 = vrsqrt.f32 %v129_v17  ;;  %vm132_vm2 = vcmp.eq.f32.partialorder %v129_v17, inf  ;;  %v135_v21 = vand.u32 2147483648, %v129_v17  ;;  %vm134_vm3 = vcmp.eq.f32.partialorder %v129_v17, 0.0 }
  0xeb   :  { %v195_v18 = vpop.eup %194 }
  0xec   :  { %v131_v19 = vmul.f32 %v195_v18, %v129_v17 }
  0xee   :  { %v133_v22 = vsel %vm132_vm2, %v129_v17, %v131_v19 }
  0xef   :  { %v136_v23 = vsel %vm134_vm3, %v135_v21, %v133_v22 }
  0xf0   :  { %v145_v24 = vsub.f32 %v143_v20, %v136_v23 }
  0xf2   :  { %v173_v25 = vmul.f32 -1.442695, %v145_v24 }
  0xf4   :  { %196 = vpow2.f32 %v173_v25 }
 0x101   :  { %v197_v26 = vpop.eup %196 }
 0x102   :  { %v149_v27 = vadd.f32 1.0, %v197_v26 }
 0x104   :  { %198 = vrcp.f32 %v149_v27 }
 0x111   :  { %v199_v28 = vpop.eup %198 }
 0x112   :  { %153 = vst.msk [vmem:[#allocation5] sm:$0xff] %vm152_vm4, %v199_v28 }
 0x113   :  { %231 = shalt.err (!%p228_p9)
}
 0x114   :  { %163 = dma.vmem_to_hbm [thread:$0]  %s161_s1, 128, %s295_s4, [#allocation4]  }
 0x115   :  { %242 = dma.done.wait [#allocation4], 128  }
 0x116   :  { %243 = vsyncadd [#allocation4], 4294967168 }
 0x117   :  { %167 = vsyncpa [#allocation3], 1 }
 0x118   :  { %168 = vsyncpa [#allocation4], 1 }

</bundles_post_ra>
